<compile_context>
chip_gen: v6e
topology: v6e:2x2x1
jax: 0.10.0
libtpu: 0.0.40
codegen_flags: <defaults>
</compile_context>

<pallas_src>
import jax
import jax.numpy as jnp
from jax.experimental import pallas as pl
from jax.experimental.pallas import tpu as pltpu


def _linear_kernel(x_ref, w_ref, b_ref, o_ref):
    # x_ref: (TB, 512)     VMEM   batch tile of activations
    # w_ref: (512, C_pad)  VMEM   pre-transposed weight, classes padded to 128
    # b_ref: (1, C)        VMEM   unpadded bias row
    # o_ref: (TB, C)       VMEM   unpadded output tile (C = true class count)
    acc = jnp.dot(x_ref[...], w_ref[...], preferred_element_type=jnp.float32)
    c = o_ref.shape[-1]
    o_ref[...] = (acc[:, :c] + b_ref[...]).astype(o_ref.dtype)


def prepare_params(weight, bias, lane=128, param_dtype=None):
    """One-time (load-time) parameter prep.

    weight: (C, 512), bias: (C,)
      -> w_pad: (512, C_pad)  pre-transposed, classes zero-padded to 128 lanes
         b2:    (1, C)        bias as a row
    Optionally cast weight to `param_dtype` (e.g. bf16) -- activations will be
    cast to match in svm_forward; accumulation stays f32.
    """
    C, D = weight.shape
    c_pad = ((C + lane - 1) // lane) * lane
    w_pad = jnp.zeros((D, c_pad), weight.dtype).at[:, :C].set(weight.T)
    if param_dtype is not None:
        w_pad = w_pad.astype(param_dtype)
    b2 = bias.reshape(1, C)
    return w_pad, b2, C


def _round_up(x, m):
    return ((x + m - 1) // m) * m


def _pick_batch_tile(B):
    if B < 512:
        return B  # single block covering the whole (small) batch
    # Target ~4 grid steps (>=2 so both v7x TensorCores run), tiles a multiple
    # of 256, capped at 512 rows.
    return min(512, _round_up(pl.cdiv(B, 4), 256))


def svm_forward(x, w_pad, b2, classes):
    """x: (B, 512), w_pad: (512, C_pad), b2: (1, classes) -> (B, classes) f32."""
    B, D = x.shape
    d_w, c_pad = w_pad.shape
    assert d_w == D
    if x.dtype != w_pad.dtype:
        # Optional bf16 activations: halves the dominant HBM stream.
        x = x.astype(w_pad.dtype)

    tb = _pick_batch_tile(B)
    grid = (pl.cdiv(B, tb),)

    cost = pl.CostEstimate(
        flops=2 * B * D * c_pad,
        transcendentals=0,
        bytes_accessed=(x.size * x.dtype.itemsize
                        + w_pad.size * w_pad.dtype.itemsize
                        + b2.size * b2.dtype.itemsize
                        + B * classes * 4),
    )

    return pl.pallas_call(
        _linear_kernel,
        out_shape=jax.ShapeDtypeStruct((B, classes), jnp.float32),
        grid=grid,
        in_specs=[
            pl.BlockSpec((tb, D), lambda i: (i, 0)),        # batch-tiled activations
            pl.BlockSpec((D, c_pad), lambda i: (0, 0)),     # weight VMEM-resident
            pl.BlockSpec((1, classes), lambda i: (0, 0)),   # bias VMEM-resident
        ],
        out_specs=pl.BlockSpec((tb, classes), lambda i: (i, 0)),
        compiler_params=pltpu.CompilerParams(
            dimension_semantics=("parallel",),              # megacore-shardable
        ),
        cost_estimate=cost,
    )(x, w_pad, b2)


if __name__ == "__main__":
    # Deterministic synthetic parameters matching nn.Linear(512, classes).
    classes = 16
    in_features = 512

    key = jax.random.PRNGKey(0)
    kx, kw, kb, kx2 = jax.random.split(key, 4)

    # PyTorch default init is U(-1/sqrt(fan_in), 1/sqrt(fan_in)); mimic it.
    bound = 1.0 / (in_features ** 0.5)
    weight = jax.random.uniform(kw, (classes, in_features), dtype=jnp.float32,
                                minval=-bound, maxval=bound)
    bias = jax.random.uniform(kb, (classes,), dtype=jnp.float32,
                              minval=-bound, maxval=bound)

    # One-time parameter prep (model-load time in a real app). f32 for exact
    # PyTorch parity; pass param_dtype=jnp.bfloat16 for the bf16 fast path.
    w_pad, b2, _ = prepare_params(weight, bias)

    # Small batch: single grid step.
    x = jax.random.normal(kx, (8, in_features), dtype=jnp.float32)
    out = jax.block_until_ready(svm_forward(x, w_pad, b2, classes))
    ref = x @ weight.T + bias
    assert out.shape == (8, classes)
    assert jnp.allclose(out, ref, atol=1e-5, rtol=1e-5)

    # Larger batch: multiple grid steps incl. a partial last tile (600 = 2*256 + 88).
    x2 = jax.random.normal(kx2, (600, in_features), dtype=jnp.float32)
    out2 = jax.block_until_ready(svm_forward(x2, w_pad, b2, classes))
    ref2 = x2 @ weight.T + bias
    assert out2.shape == (600, classes)
    assert jnp.allclose(out2, ref2, atol=1e-4, rtol=1e-4)

    print("KERNEL_OK")
</pallas_src>

<mosaic_0001>
module attributes {stable_mosaic.version = 11 : i64} {
  func.func @_linear_kernel(%arg0: i32, %arg1: memref<8x512xf32, #tpu.memory_space<vmem>>, %arg2: memref<512x128xf32, #tpu.memory_space<vmem>>, %arg3: memref<1x16xf32, #tpu.memory_space<vmem>>, %arg4: memref<8x16xf32, #tpu.memory_space<vmem>>) attributes {dimension_semantics = [#tpu.dimension_semantics<parallel>], iteration_bounds = array<i64: 1>, scalar_prefetch = 0 : i64, scratch_operands = 0 : i64, tpu.core_type = #tpu.core_type<tc>, window_params = [{transform_indices = @transform_0, window_bounds = array<i64: 8, 512>}, {pipeline_mode = #tpu.pipeline_mode<synchronous>, transform_indices = @transform_1, window_bounds = array<i64: 512, 128>}, {pipeline_mode = #tpu.pipeline_mode<synchronous>, transform_indices = @transform_2, window_bounds = array<i64: 1, 16>}, {transform_indices = @transform_3, window_bounds = array<i64: 8, 16>}]} {
    %c0 = arith.constant 0 : index
    %c0_0 = arith.constant 0 : index
    %0 = vector.load %arg1[%c0, %c0_0] : memref<8x512xf32, #tpu.memory_space<vmem>>, vector<8x512xf32>
    %c0_1 = arith.constant 0 : index
    %c0_2 = arith.constant 0 : index
    %1 = vector.load %arg2[%c0_1, %c0_2] : memref<512x128xf32, #tpu.memory_space<vmem>>, vector<512x128xf32>
    %cst = arith.constant dense<0.000000e+00> : vector<8x128xf32>
    %2 = tpu.matmul %0, %1, %cst {dimension_numbers = #tpu.dot_dimension_numbers<[1], [0], [0], [1], [0, 0, 1, 1], [], []>} : vector<8x512xf32>, vector<512x128xf32>, vector<8x128xf32> -> vector<8x128xf32>
    %3 = vector.extract_strided_slice %2 {offsets = [0, 0], sizes = [8, 16], strides = [1, 1]} : vector<8x128xf32> to vector<8x16xf32>
    %c0_3 = arith.constant 0 : index
    %c0_4 = arith.constant 0 : index
    %4 = vector.load %arg3[%c0_3, %c0_4] : memref<1x16xf32, #tpu.memory_space<vmem>>, vector<1x16xf32>
    %5 = vector.broadcast %4 : vector<1x16xf32> to vector<8x16xf32>
    %6 = arith.addf %3, %5 : vector<8x16xf32>
    %c0_5 = arith.constant 0 : index
    %c0_6 = arith.constant 0 : index
    %7 = vector.load %arg4[%c0_5, %c0_6] : memref<8x16xf32, #tpu.memory_space<vmem>>, vector<8x16xf32>
    tpu.vector_store %arg4[%c0_5, %c0_6], %6 {strides = array<i32>} : memref<8x16xf32, #tpu.memory_space<vmem>>, vector<8x16xf32>,
    return
  }
  func.func @transform_0(%arg0: i32) -> (i32, i32) {
    %c0_i32 = arith.constant 0 : i32
    %c0_i32_0 = arith.constant 0 : i32
    return %arg0, %c0_i32 : i32, i32
  }
  func.func @transform_1(%arg0: i32) -> (i32, i32) {
    %c0_i32 = arith.constant 0 : i32
    %c0_i32_0 = arith.constant 0 : i32
    %c0_i32_1 = arith.constant 0 : i32
    return %c0_i32, %c0_i32_0 : i32, i32
  }
  func.func @transform_2(%arg0: i32) -> (i32, i32) {
    %c0_i32 = arith.constant 0 : i32
    %c0_i32_0 = arith.constant 0 : i32
    %c0_i32_1 = arith.constant 0 : i32
    return %c0_i32, %c0_i32_0 : i32, i32
  }
  func.func @transform_3(%arg0: i32) -> (i32, i32) {
    %c0_i32 = arith.constant 0 : i32
    %c0_i32_0 = arith.constant 0 : i32
    return %arg0, %c0_i32 : i32, i32
  }
}

</mosaic_0001>

<bundles_post_ra>
// kernel: tpu_custom_call.1
= control target key start
LH: loop header
LB: loop body
LE: loop exit
PB: predicated region body
PF: predicated region fallthrough
CT: control target
= control target key end

     0   :  { %8 = vsyncpa [#allocation3], 0  ;;  %s454_s0 = inlined_call_operand.hbm [shape: f32[8,512], index: 0, kind: input, shape index: {}]   ;;  %s455_s1 = inlined_call_operand.hbm [shape: f32[512,128], index: 1, kind: input, shape index: {}]   ;;  %s456_s2 = inlined_call_operand.vmem [shape: f32[1,16], index: 2, kind: input, shape index: {}]   ;;  %s457_s3 = inlined_call_operand.hbm [shape: f32[8,16], index: 3, kind: output, shape index: {}]  }
   0x1   :  { %9 = vsyncpa [#allocation6], 0 }
   0x2   :  { %10 = vsyncpa [#allocation4], 0  ;;  %s417_s12 = smov [#allocation2]   ;;  %s418_s14 = smov [#allocation5]  }
   0x3   :  { %s17_s13 = sshll.u32 %s417_s12, 4  ;;  %s26_s15 = sshll.u32 %s418_s14, 4  ;;  %s18_s13 = int_to_ptr.vmem [resolvable:$true] %s17_s13  ;;  %s27_s15 = int_to_ptr.vmem [resolvable:$true] %s26_s15 }
   0x4   :  { %s359_s16 = scalar_lea.vmem %s18_s13, 512  ;;  %p364_p1 = scmp.lt.s32.totalorder %s18_s13, %s18_s13 }
   0x5   :  { %p360_p0 = scmp.ne.s32.totalorder %s18_s13, %s359_s16  ;;  %p365_p2 = scmp.lt.s32.totalorder %s359_s16, %s359_s16 }
   0x7   :  { %p366_p3 = por %p365_p2, %p364_p1 }
   0x9   :  { %p367_p4 = pnand %p366_p3, %p360_p0 }
   0xb   :  { %370 = shalt.err (!%p367_p4)
}
   0xc   :  { %20 = dma.hbm_to_vmem [thread:$0]  %s454_s0, 512, %s18_s13, [#allocation3]  }
   0xd   :  { %s379_s19 = scalar_lea.vmem %s27_s15, 8192  ;;  %p384_p6 = scmp.lt.s32.totalorder %s27_s15, %s27_s15 }
   0xe   :  { %p380_p5 = scmp.ne.s32.totalorder %s27_s15, %s379_s19  ;;  %p385_p7 = scmp.lt.s32.totalorder %s379_s19, %s379_s19 }
  0x10   :  { %p386_p8 = por %p385_p7, %p384_p6 }
  0x12   :  { %p387_p9 = pnand %p386_p8, %p380_p5 }
  0x14   :  { %390 = shalt.err (!%p387_p9)
}
  0x15   :  { %s419_s20 = smov 128   ;;  %s420_s21 = smov 8  }
  0x16   :  { %32 = dma.hbm_to_vmem [thread:$0]  %s455_s1, 8192, %s27_s15, [#allocation6], %s419_s20, %s419_s20, %s420_s21  }
  0x17   :  { %411 = dma.done.wait [#allocation3], 512  }
  0x18   :  { %412 = vsyncadd [#allocation3], 4294966784 }
  0x19   :  { %413 = dma.done.wait [#allocation6], 8192  }
  0x1a   :  { %414 = vsyncadd [#allocation6], 4294959104  ;;  %v76_v0 = vld [vmem:[#allocation5 + $0xf8] sm:$0xff]  ;;  %v75_v4 = vld [vmem:[#allocation5 + $0xf0] sm:$0xff]  ;;  %s421_s24 = smov [#allocation7]   ;;  %vm257_vm0 = vcmask 130048  }
  0x1b   :  { %v108_v1 = vld [vmem:[#allocation5 + $0x1f8] sm:$0xff]  ;;  %276 = vmatprep.subr.mxu0 %v76_v0  ;;  %v107_v5 = vld [vmem:[#allocation5 + $0x1f0] sm:$0xff]  ;;  %v74_v8 = vld [vmem:[#allocation5 + $0xe8] sm:$0xff]  ;;  %s265_s25 = sshll.u32 %s421_s24, 4  ;;  %s266_s25 = int_to_ptr.vmem [resolvable:$true] %s265_s25 }
  0x1c   :  { %v60_v2 = vld [vmem:[#allocation5 + $0x78] sm:$0xff]  ;;  %311 = vmatprep.subr.mxu1 %v108_v1  ;;  %v59_v6 = vld [vmem:[#allocation5 + $0x70] sm:$0xff]  ;;  %v106_v9 = vld [vmem:[#allocation5 + $0x1e8] sm:$0xff]  ;;  %s391_s26 = scalar_lea.vmem %s266_s25, 128  ;;  %p396_p11 = scmp.lt.s32.totalorder %s266_s25, %s266_s25 }
  0x1d   :  { %v92_v3 = vld [vmem:[#allocation5 + $0x178] sm:$0xff]  ;;  %277 = vmatpush3.msra.mxu0 %v60_v2  ;;  %v91_v7 = vld [vmem:[#allocation5 + $0x170] sm:$0xff]  ;;  %v58_v10 = vld [vmem:[#allocation5 + $0x68] sm:$0xff]  ;;  %p392_p10 = scmp.ne.s32.totalorder %s266_s25, %s391_s26  ;;  %p397_p12 = scmp.lt.s32.totalorder %s391_s26, %s391_s26 }
  0x1e   :  { %312 = vmatpush3.msra.mxu1 %v92_v3  ;;  %278 = vmatprep.subr.mxu0 %v75_v4  ;;  %v90_v11 = vld [vmem:[#allocation5 + $0x168] sm:$0xff]  ;;  %v73_v12 = vld [vmem:[#allocation5 + $0xe0] sm:$0xff]  ;;  %v72_v16 = vld [vmem:[#allocation5 + $0xd8] sm:$0xff] }
  0x1f   :  { %313 = vmatprep.subr.mxu1 %v107_v5  ;;  %279 = vmatpush3.msra.mxu0 %v59_v6  ;;  %v105_v13 = vld [vmem:[#allocation5 + $0x1e0] sm:$0xff]  ;;  %v104_v17 = vld [vmem:[#allocation5 + $0x1d8] sm:$0xff]  ;;  %v71_v20 = vld [vmem:[#allocation5 + $0xd0] sm:$0xff]  ;;  %p398_p13 = por %p397_p12, %p396_p11 }
  0x20   :  { %314 = vmatpush3.msra.mxu1 %v91_v7  ;;  %280 = vmatprep.subr.mxu0 %v74_v8  ;;  %v57_v14 = vld [vmem:[#allocation5 + $0x60] sm:$0xff]  ;;  %v56_v18 = vld [vmem:[#allocation5 + $0x58] sm:$0xff]  ;;  %v103_v21 = vld [vmem:[#allocation5 + $0x1d0] sm:$0xff] }
  0x21   :  { %315 = vmatprep.subr.mxu1 %v106_v9  ;;  %v89_v15 = vld [vmem:[#allocation5 + $0x160] sm:$0xff]  ;;  %281 = vmatpush3.msra.mxu0 %v58_v10  ;;  %v88_v19 = vld [vmem:[#allocation5 + $0x158] sm:$0xff]  ;;  %v55_v22 = vld [vmem:[#allocation5 + $0x50] sm:$0xff]  ;;  %p399_p0 = pnand %p398_p13, %p392_p10 }
  0x22   :  { %316 = vmatpush3.msra.mxu1 %v90_v11  ;;  %282 = vmatprep.subr.mxu0 %v73_v12  ;;  %v87_v23 = vld [vmem:[#allocation5 + $0x150] sm:$0xff]  ;;  %v70_v24 = vld [vmem:[#allocation5 + $0xc8] sm:$0xff]  ;;  %v69_v28 = vld [vmem:[#allocation5 + $0xc0] sm:$0xff] }
  0x23   :  { %317 = vmatprep.subr.mxu1 %v105_v13  ;;  %283 = vmatpush3.msra.mxu0 %v57_v14  ;;  %v102_v25 = vld [vmem:[#allocation5 + $0x1c8] sm:$0xff]  ;;  %v101_v29 = vld [vmem:[#allocation5 + $0x1c0] sm:$0xff]  ;;  %v68_v32 = vld [vmem:[#allocation5 + $0xb8] sm:$0xff] }
  0x24   :  { %318 = vmatpush3.msra.mxu1 %v89_v15  ;;  %284 = vmatprep.subr.mxu0 %v72_v16  ;;  %v54_v26 = vld [vmem:[#allocation5 + $0x48] sm:$0xff]  ;;  %v53_v30 = vld [vmem:[#allocation5 + $0x40] sm:$0xff]  ;;  %v100_v33 = vld [vmem:[#allocation5 + $0x1b8] sm:$0xff] }
  0x25   :  { %319 = vmatprep.subr.mxu1 %v104_v17  ;;  %285 = vmatpush3.msra.mxu0 %v56_v18  ;;  %v86_v27 = vld [vmem:[#allocation5 + $0x148] sm:$0xff]  ;;  %v85_v31 = vld [vmem:[#allocation5 + $0x140] sm:$0xff]  ;;  %v52_v34 = vld [vmem:[#allocation5 + $0x38] sm:$0xff] }
  0x26   :  { %320 = vmatpush3.msra.mxu1 %v88_v19  ;;  %286 = vmatprep.subr.mxu0 %v71_v20  ;;  %v84_v35 = vld [vmem:[#allocation5 + $0x138] sm:$0xff]  ;;  %v67_v36 = vld [vmem:[#allocation5 + $0xb0] sm:$0xff]  ;;  %v66_v40 = vld [vmem:[#allocation5 + $0xa8] sm:$0xff] }
  0x27   :  { %321 = vmatprep.subr.mxu1 %v103_v21  ;;  %287 = vmatpush3.msra.mxu0 %v55_v22  ;;  %v99_v37 = vld [vmem:[#allocation5 + $0x1b0] sm:$0xff]  ;;  %v98_v41 = vld [vmem:[#allocation5 + $0x1a8] sm:$0xff]  ;;  %v65_v44 = vld [vmem:[#allocation5 + $0xa0] sm:$0xff] }
  0x28   :  { %322 = vmatpush3.msra.mxu1 %v87_v23  ;;  %288 = vmatprep.subr.mxu0 %v70_v24  ;;  %v51_v38 = vld [vmem:[#allocation5 + $0x30] sm:$0xff]  ;;  %v50_v42 = vld [vmem:[#allocation5 + $0x28] sm:$0xff]  ;;  %v97_v45 = vld [vmem:[#allocation5 + $0x1a0] sm:$0xff] }
  0x29   :  { %323 = vmatprep.subr.mxu1 %v102_v25  ;;  %289 = vmatpush3.msra.mxu0 %v54_v26  ;;  %v83_v39 = vld [vmem:[#allocation5 + $0x130] sm:$0xff]  ;;  %v82_v43 = vld [vmem:[#allocation5 + $0x128] sm:$0xff]  ;;  %v49_v46 = vld [vmem:[#allocation5 + $0x20] sm:$0xff] }
  0x2a   :  { %324 = vmatpush3.msra.mxu1 %v86_v27  ;;  %290 = vmatprep.subr.mxu0 %v69_v28  ;;  %v81_v47 = vld [vmem:[#allocation5 + $0x120] sm:$0xff]  ;;  %v64_v48 = vld [vmem:[#allocation5 + $0x98] sm:$0xff]  ;;  %v63_v52 = vld [vmem:[#allocation5 + $0x90] sm:$0xff] }
  0x2b   :  { %325 = vmatprep.subr.mxu1 %v101_v29  ;;  %291 = vmatpush3.msra.mxu0 %v53_v30  ;;  %v96_v49 = vld [vmem:[#allocation5 + $0x198] sm:$0xff]  ;;  %v95_v53 = vld [vmem:[#allocation5 + $0x190] sm:$0xff]  ;;  %v62_v56 = vld [vmem:[#allocation5 + $0x88] sm:$0xff] }
  0x2c   :  { %326 = vmatpush3.msra.mxu1 %v85_v31  ;;  %292 = vmatprep.subr.mxu0 %v68_v32  ;;  %v48_v50 = vld [vmem:[#allocation5 + $0x18] sm:$0xff]  ;;  %v47_v54 = vld [vmem:[#allocation5 + $0x10] sm:$0xff]  ;;  %v94_v57 = vld [vmem:[#allocation5 + $0x188] sm:$0xff] }
  0x2d   :  { %327 = vmatprep.subr.mxu1 %v100_v33  ;;  %293 = vmatpush3.msra.mxu0 %v52_v34  ;;  %v80_v51 = vld [vmem:[#allocation5 + $0x118] sm:$0xff]  ;;  %v79_v55 = vld [vmem:[#allocation5 + $0x110] sm:$0xff]  ;;  %v46_v58 = vld [vmem:[#allocation5 + $0x8] sm:$0xff] }
  0x2e   :  { %328 = vmatpush3.msra.mxu1 %v84_v35  ;;  %294 = vmatprep.subr.mxu0 %v67_v36  ;;  %v78_v59 = vld [vmem:[#allocation5 + $0x108] sm:$0xff]  ;;  %v61_v60 = vld [vmem:[#allocation5 + $0x80] sm:$0xff]  ;;  %v44_v1 = vld [vmem:[#allocation2 + $0x18] sm:$0xff] }
  0x2f   :  { %329 = vmatprep.subr.mxu1 %v99_v37  ;;  %295 = vmatpush3.msra.mxu0 %v51_v38  ;;  %v93_v61 = vld [vmem:[#allocation5 + $0x180] sm:$0xff]  ;;  %v42_v63 = vld [vmem:[#allocation2 + $0x8] sm:$0xff]  ;;  %v43_v3 = vld [vmem:[#allocation2 + $0x10] sm:$0xff] }
  0x30   :  { %330 = vmatpush3.msra.mxu1 %v83_v39  ;;  %296 = vmatprep.subr.mxu0 %v66_v40  ;;  %v45_v62 = vld [vmem:[#allocation5] sm:$0xff] }
  0x31   :  { %331 = vmatprep.subr.mxu1 %v98_v41  ;;  %297 = vmatpush3.msra.mxu0 %v50_v42  ;;  %v77_v0 = vld [vmem:[#allocation5 + $0x100] sm:$0xff] }
  0x32   :  { %332 = vmatpush3.msra.mxu1 %v82_v43  ;;  %298 = vmatprep.subr.mxu0 %v65_v44  ;;  %v41_v2 = vld [vmem:[#allocation2] sm:$0xff] }
  0x33   :  { %333 = vmatprep.subr.mxu1 %v97_v45  ;;  %299 = vmatpush3.msra.mxu0 %v49_v46  ;;  %v275_v10 = vld [vmem:[%s456_s2] ss:$0 sm:$0xff] }
  0x34   :  { %334 = vmatpush3.msra.mxu1 %v81_v47  ;;  %300 = vmatprep.subr.mxu0 %v64_v48 }
  0x35   :  { %335 = vmatprep.subr.mxu1 %v96_v49  ;;  %301 = vmatpush3.msra.mxu0 %v48_v50 }
  0x36   :  { %336 = vmatpush3.msra.mxu1 %v80_v51  ;;  %302 = vmatprep.subr.mxu0 %v63_v52 }
  0x37   :  { %337 = vmatprep.subr.mxu1 %v95_v53  ;;  %303 = vmatpush3.msra.mxu0 %v47_v54 }
  0x38   :  { %338 = vmatpush3.msra.mxu1 %v79_v55  ;;  %304 = vmatprep.subr.mxu0 %v62_v56 }
  0x39   :  { %339 = vmatprep.subr.mxu1 %v94_v57  ;;  %305 = vmatpush3.msra.mxu0 %v46_v58 }
  0x3a   :  { %340 = vmatpush3.msra.mxu1 %v78_v59  ;;  %306 = vmatprep.subr.mxu0 %v61_v60 }
  0x3b   :  { %341 = vmatprep.subr.mxu1 %v93_v61  ;;  %307 = vmatpush3.msra.mxu0 %v45_v62 }
  0x3c   :  { %173 = vmatprep.mubr.f32.mxu0 %v42_v63  ;;  %342 = vmatpush3.msra.mxu1 %v77_v0 }
  0x3d   :  { %243 = vmatprep.mubr.f32.mxu1 %v44_v1  ;;  %174 = vmatmul.mubr.f32.vlgmr.msra.gmra.mxu0 %v41_v2 }
  0x3e   :  { %244 = vmatmul.mubr.f32.vlgmr.msra.gmra.mxu1 %v43_v3 }
  0xfd   :  { %v308_v4 = vpop.f32.mrf.mxu0 }
  0xfe   :  { %v343_v5 = vpop.f32.mrf.mxu1 }
  0xff   :  { %v309_v6 = vpop.f32.mrf.mxu0 }
 0x100   :  { %v344_v7 = vpop.f32.mrf.mxu1  ;;  %v310_v8 = vadd.f32 %v309_v6, %v308_v4 }
 0x101   :  { %v345_v9 = vadd.f32 %v344_v7, %v343_v5 }
 0x103   :  { %v246_v11 = vadd.f32 %v345_v9, %v310_v8 }
 0x105   :  { %v256_v12 = vadd.f32 %v275_v10, %v246_v11 }
 0x107   :  { %258 = vst.msk [vmem:[#allocation7] sm:$0xff] %vm257_vm0, %v256_v12 }
 0x108   :  { %402 = shalt.err (!%p399_p0)
}
 0x109   :  { %268 = dma.vmem_to_hbm [thread:$0]  %s266_s25, 128, %s457_s3, [#allocation4]  }
 0x10a   :  { %415 = dma.done.wait [#allocation4], 128  }
 0x10b   :  { %416 = vsyncadd [#allocation4], 4294967168 }
 0x10c   :  { %272 = vsyncpa [#allocation3], 1 }
 0x10d   :  { %273 = vsyncpa [#allocation6], 1 }
 0x10e   :  { %274 = vsyncpa [#allocation4], 1 }

</bundles_post_ra>
